<compile_context>
chip_gen: v7x
topology: tpu7x:2x2x1
jax: 0.10.0
libtpu: 0.0.40
codegen_flags: <defaults>
</compile_context>

<pallas_src>
import functools
import numpy as np
import jax
import jax.numpy as jnp
from jax.experimental import pallas as pl
from jax.experimental.pallas import tpu as pltpu

INF = 100000000.0
NEG_INF = -1e30


def _round_up(x, m):
    return ((x + m - 1) // m) * m


# ---------------------------------------------------------------------------
# Pallas kernel (transposed cost tile)
#   cls_ref : (1, TQ)   class_weight * focal class cost per query (queries on lanes)
#   tgt_ref : (TM, K)   target ctrl points (targets on sublanes, K coords on lanes)
#   outT_ref: (K, TQ)   query ctrl points transposed (queries on lanes)
#   c_ref   : (TM, TQ)  fp32 cost tile  C_T[m, q]
# Grid = (bs, target_tiles, query_tiles); every axis independent -> "parallel".
# ---------------------------------------------------------------------------
def _cost_kernel(cls_ref, tgt_ref, outT_ref, c_ref, *, coord_weight, K,
                 sub_m=128, sub_q=128):
    TM, TQ = c_ref.shape
    w = float(coord_weight)
    prescale = (w >= 0.0) and (w != 1.0)   # |w*a - w*b| == w*|a - b| for w >= 0

    # Sub-block the compute so the accumulator stays vreg-resident:
    # a (128, 128) f32 acc is 16 vregs; acc + temps ~48 vregs (< 64-entry RF).
    for q0 in range(0, TQ, sub_q):
        sq = min(sub_q, TQ - q0)
        o_blk = outT_ref[:, q0:q0 + sq].astype(jnp.float32)       # (K, sq) - small load
        if prescale:
            o_blk = o_blk * w                                      # fold coord_weight here
        cls_row = cls_ref[:, q0:q0 + sq]                           # (1, sq), already *class_weight
        for m0 in range(0, TM, sub_m):
            sm = min(sub_m, TM - m0)
            t_blk = tgt_ref[m0:m0 + sm, :].astype(jnp.float32)     # (sm, K) - small load
            if prescale:
                t_blk = t_blk * w
            # K-step L1 accumulation, statically unrolled; pure VPU work on a
            # vreg-resident (sm, sq) accumulator, stored to c_ref exactly once.
            acc = jnp.abs(t_blk[:, 0:1] - o_blk[0:1, :])
            for k in range(1, K):
                acc = acc + jnp.abs(t_blk[:, k:k + 1] - o_blk[k:k + 1, :])
            if w < 0.0:                                            # rare: keep exact semantics
                acc = acc * w
            c_ref[m0:m0 + sm, q0:q0 + sq] = cls_row + acc


def _choose_tiles(bs, nq, Mmax, tile_t, tile_q):
    """Static tile / padded-extent selection (trace-time Python ints)."""
    tq = min(_round_up(int(tile_q), 128), _round_up(nq, 128))      # lane-dense query tiles
    Np = _round_up(nq, tq)
    Mr = _round_up(max(int(Mmax), 1), 8)
    tm = min(_round_up(int(tile_t), 8), Mr)
    # v7x has 2 TensorCores: when bs == 1, split the target axis so >= 2 parallel
    # grid steps exist (costs nothing on v5e/v6e).
    if bs * ((Mr + tm - 1) // tm) < 2 and Mr >= 16:
        tm = _round_up((Mr + 1) // 2, 8)
    Mp = _round_up(Mr, tm)
    return tq, Np, tm, Mp


def _pallas_cost_T(cls_pad, tgt_pad, outT_pad, *, tm, tq, K, coord_weight):
    """cls_pad (bs,1,Np), tgt_pad (bs,Mp,K), outT_pad (bs,K,Np) -> C_T (bs,Mp,Np)."""
    bs, Mp, _ = tgt_pad.shape
    Np = outT_pad.shape[-1]
    kernel = functools.partial(_cost_kernel, coord_weight=float(coord_weight), K=int(K))
    # VMEM footprint (double-buffered) at the default 1024x512 tile: ~4.5 MiB,
    # well inside the scoped-VMEM defaults on v5e/v6e/v7x.
    return pl.pallas_call(
        kernel,
        out_shape=jax.ShapeDtypeStruct((bs, Mp, Np), jnp.float32),
        grid_spec=pltpu.PrefetchScalarGridSpec(
            num_scalar_prefetch=0,
            grid=(bs, Mp // tm, Np // tq),
            in_specs=[pl.BlockSpec((None, 1, tq), lambda b, i, j: (b, 0, j)),
                      pl.BlockSpec((None, tm, K), lambda b, i, j: (b, i, 0)),
                      pl.BlockSpec((None, K, tq), lambda b, i, j: (b, 0, j))],
            out_specs=pl.BlockSpec((None, tm, tq), lambda b, i, j: (b, i, j))),
        compiler_params=pltpu.CompilerParams(
            dimension_semantics=("parallel", "parallel", "parallel")),
    )(cls_pad, tgt_pad, outT_pad)


# ---------------------------------------------------------------------------
# CTC text cost (plain JAX forward DP).
# TODO(synk): CTC forward DP kept as lax.scan (sequential over time), not Pallas.
# ---------------------------------------------------------------------------
def _ctc_loss_single(log_probs, target, target_len, blank):
    # log_probs: (T, C) already log-softmaxed; target: (Lmax,) int32; target_len scalar.
    Lmax = target.shape[0]
    S = 2 * Lmax + 1
    ext = jnp.full((S,), blank, dtype=jnp.int32).at[1::2].set(target)
    ext_prev2 = jnp.concatenate([jnp.full((2,), -1, dtype=jnp.int32), ext[:-2]])
    can_skip = (jnp.arange(S) >= 2) & (ext != blank) & (ext != ext_prev2)

    alpha0 = jnp.full((S,), NEG_INF, dtype=jnp.float32)
    alpha0 = alpha0.at[0].set(log_probs[0, blank])
    alpha0 = alpha0.at[1].set(log_probs[0, ext[1]])

    def step(alpha, lp_t):
        a1 = jnp.concatenate([jnp.full((1,), NEG_INF, jnp.float32), alpha[:-1]])
        a2 = jnp.concatenate([jnp.full((2,), NEG_INF, jnp.float32), alpha[:-2]])
        a2 = jnp.where(can_skip, a2, NEG_INF)
        m = jnp.maximum(jnp.maximum(alpha, a1), a2)
        lse = m + jnp.log(jnp.exp(alpha - m) + jnp.exp(a1 - m) + jnp.exp(a2 - m))
        return lse + lp_t[ext], None

    alpha_T, _ = jax.lax.scan(step, alpha0, log_probs[1:])
    s_last = 2 * target_len
    end1 = alpha_T[s_last]
    # target_len == 0 (padded rows): no negative-index wraparound; loss = -logP(all blanks).
    end2 = jnp.where(target_len > 0, alpha_T[jnp.maximum(s_last - 1, 0)],
                     jnp.float32(NEG_INF))
    m = jnp.maximum(end1, end2)
    loss = -(m + jnp.log(jnp.exp(end1 - m) + jnp.exp(end2 - m)))
    # zero_infinity=True; also zero out NaN for safety.
    return jnp.where(jnp.isnan(loss) | (loss > 1e29), 0.0, loss)


# ---------------------------------------------------------------------------
# Single jitted device dispatch: Pallas cost matrix + CTC text cost +
# top-k / argmin one-to-many matching. Returns only two small (bs, nq) arrays.
# ---------------------------------------------------------------------------
@functools.partial(jax.jit, static_argnames=("class_weight", "coord_weight", "text_weight",
                                             "alpha", "gamma", "mn", "blank",
                                             "tile_t", "tile_q"))
def _forward_device(logits_c0, out_pts, pred_text_logits, tgt_pts_padded, texts_padded,
                    sizes_arr, *, class_weight, coord_weight, text_weight, alpha, gamma,
                    mn, blank, tile_t, tile_q):
    bs, nq, _ = logits_c0.shape
    K = out_pts.shape[-1]
    Mmax = tgt_pts_padded.shape[1]
    tq, Np, tm, Mp = _choose_tiles(bs, nq, Mmax, tile_t, tile_q)

    # ---- focal class cost per query (tiny bs*nq*P op; hoisted out of the kernel) ----
    prob = jax.nn.sigmoid(logits_c0.astype(jnp.float32))                     # (bs, nq, P)
    if float(gamma) == 2.0:
        pg, qg = prob * prob, (1.0 - prob) * (1.0 - prob)
    else:
        pg, qg = jnp.power(prob, gamma), jnp.power(1.0 - prob, gamma)
    neg_cost = (1.0 - alpha) * pg * (-jnp.log(1.0 - prob + 1e-8))
    pos_cost = alpha * qg * (-jnp.log(prob + 1e-8))
    cls_q = class_weight * jnp.mean(pos_cost - neg_cost, axis=-1)            # (bs, nq)

    # ---- padded, kernel-friendly layouts (all tiny vs. the cost matrix) ----
    cls_pad = jnp.pad(cls_q, ((0, 0), (0, Np - nq)))[:, None, :]             # (bs, 1, Np)
    outT_pad = jnp.transpose(
        jnp.pad(out_pts.astype(jnp.float32), ((0, 0), (0, Np - nq), (0, 0))),
        (0, 2, 1))                                                           # (bs, K, Np)
    tgt_pad = jnp.pad(tgt_pts_padded.astype(jnp.float32),
                      ((0, 0), (0, Mp - Mmax), (0, 0)))                      # (bs, Mp, K)

    # ---- geometric + class cost, emitted already transposed (Pallas) ----
    C_T = _pallas_cost_T(cls_pad, tgt_pad, outT_pad, tm=tm, tq=tq, K=K,
                         coord_weight=coord_weight)                          # (bs, Mp, Np)

    # ---- CTC text cost, vmapped directly in (batch, target, query) order ----
    log_probs = jax.nn.log_softmax(pred_text_logits.astype(jnp.float32), axis=-1)
    tgt_lens = jnp.sum((texts_padded != blank).astype(jnp.int32), axis=-1)   # (bs, Mmax)

    def per_batch(lp_b, tg_b, tl_b):
        def per_target(tg, tl):
            return jax.vmap(lambda lp_q: _ctc_loss_single(lp_q, tg, tl, blank))(lp_b)
        return jax.vmap(per_target)(tg_b, tl_b)                              # (Mmax, nq)

    text_T = jax.vmap(per_batch)(log_probs, texts_padded, tgt_lens)          # (bs, Mmax, nq)
    text_T = text_T / jnp.maximum(tgt_lens, 1).astype(jnp.float32)[:, :, None]
    text_T = jnp.pad(text_T, ((0, 0), (0, Mp - Mmax), (0, Np - nq)))         # (bs, Mp, Np)

    cost_T = C_T + text_weight * text_T                                      # (bs, Mp, Np)

    # ---- one-to-many matching (torch.topk(largest=False) + argmin reduction) ----
    q_valid = jnp.arange(Np) < nq                       # padded queries must never be picked
    neg_c = jnp.where(q_valid[None, None, :], -cost_T, jnp.float32(NEG_INF))
    _, topk_idx = jax.lax.top_k(neg_c, mn)                                   # (bs, Mp, mn)
    sel_T = jnp.any(topk_idx[..., None] == jnp.arange(Np)[None, None, None, :], axis=2)
    t_valid = jnp.arange(Mp)[None, :] < sizes_arr[:, None]                   # mask padded targets
    sel_T = jnp.logical_and(sel_T, t_valid[:, :, None])                      # (bs, Mp, Np)

    cost_inf = jnp.where(sel_T, cost_T, jnp.float32(INF))
    selected_q = jnp.any(sel_T, axis=1)[:, :nq]                              # (bs, nq)
    min_idx = jnp.argmin(cost_inf, axis=1).astype(jnp.int32)[:, :nq]         # (bs, nq)
    return selected_q, min_idx


# ---------------------------------------------------------------------------
# Matcher forward (use_dynamic_k=False path of the reference module)
# ---------------------------------------------------------------------------
def one2many_matcher_forward(outputs, targets, *, class_weight=1.0, coord_weight=1.0,
                             text_weight=1.0, focal_alpha=0.25, focal_gamma=2.0,
                             match_num=5, topk=13, use_dynamic_k=False,
                             specific_match_num=None, tile_t=1024, tile_q=512):
    if use_dynamic_k:
        # TODO(synk): dynamic-k branch (gen_relative_distance_mat + per-gt variable
        # top-k from boundary points) not implemented; default path is use_dynamic_k=False.
        raise NotImplementedError("dynamic-k branch not implemented")

    sizes = [int(v['ctrl_points'].shape[0]) for v in targets]
    bs, num_queries = outputs['pred_logits'].shape[:2]
    mn = int(specific_match_num if specific_match_num is not None else match_num)
    Mmax = max(sizes) if len(sizes) else 0

    empty = (np.zeros((0,), np.int64), np.zeros((0,), np.int64))
    if Mmax == 0:
        return [empty for _ in range(bs)]

    voc = int(outputs['pred_text_logits'].shape[-1]) - 1
    Lmax = int(targets[0]['texts'].shape[-1])
    K = int(np.prod(outputs['pred_ctrl_points'].shape[2:]))

    # Per-batch target padding to Mmax (only the per-batch diagonal blocks of the
    # reference's (bs*nq, total_tgt) cost matrix are ever used by the matcher).
    tgt_pts_padded = np.zeros((bs, Mmax, K), np.float32)
    texts_padded = np.full((bs, Mmax, Lmax), voc, np.int32)
    for b, v in enumerate(targets):
        m = sizes[b]
        if m > 0:
            tgt_pts_padded[b, :m] = np.asarray(v['ctrl_points'], np.float32).reshape(m, K)
            texts_padded[b, :m] = np.asarray(v['texts'], np.int32).reshape(m, Lmax)

    selected_q, min_idx = _forward_device(
        jnp.asarray(outputs['pred_logits'])[..., 0],                     # (bs, nq, n_ctrl)
        jnp.asarray(outputs['pred_ctrl_points']).reshape(bs, num_queries, K),
        jnp.asarray(outputs['pred_text_logits']),
        jnp.asarray(tgt_pts_padded), jnp.asarray(texts_padded),
        jnp.asarray(sizes, dtype=jnp.int32),
        class_weight=float(class_weight), coord_weight=float(coord_weight),
        text_weight=float(text_weight), alpha=float(focal_alpha),
        gamma=float(focal_gamma), mn=mn, blank=voc,
        tile_t=int(tile_t), tile_q=int(tile_q))

    selected_q, min_idx = jax.block_until_ready((selected_q, min_idx))
    sel_np = np.asarray(selected_q)
    min_np = np.asarray(min_idx)

    # Final variable-length index extraction (data-dependent sizes) on host.
    o2m_indices = []
    for b in range(bs):
        if sizes[b] == 0:
            o2m_indices.append(empty)
            continue
        src = np.nonzero(sel_np[b])[0].astype(np.int64)      # == torch.unique (sorted)
        tgt = min_np[b][src].astype(np.int64)
        o2m_indices.append((src, tgt))
    return o2m_indices


# ---------------------------------------------------------------------------
if __name__ == "__main__":
    key = jax.random.PRNGKey(0)
    bs, nq, n_ctrl, n_txt_pts, voc, Lmax = 2, 8, 8, 16, 4, 6
    sizes = [3, 2]

    k0, k1, k2, k3 = jax.random.split(key, 4)
    outputs = {
        "pred_logits": jax.random.normal(k0, (bs, nq, n_ctrl, 1), jnp.float32),
        "pred_ctrl_points": jax.random.uniform(k1, (bs, nq, n_ctrl, 2), jnp.float32),
        "pred_text_logits": jax.random.normal(k2, (bs, nq, n_txt_pts, voc + 1), jnp.float32),
    }

    targets = []
    tk = k3
    for m in sizes:
        tk, ka, kb, kc = jax.random.split(tk, 4)
        ctrl = jax.random.uniform(ka, (m, n_ctrl, 2), jnp.float32)
        lens = jax.random.randint(kb, (m,), 1, Lmax + 1)
        chars = jax.random.randint(kc, (m, Lmax), 0, voc)
        pos = jnp.arange(Lmax)[None, :]
        texts = jnp.where(pos < lens[:, None], chars, voc).astype(jnp.int32)
        targets.append({"ctrl_points": ctrl, "texts": texts})

    o2m = one2many_matcher_forward(outputs, targets,
                                   class_weight=1.0, coord_weight=1.0, text_weight=1.0,
                                   focal_alpha=0.25, focal_gamma=2.0, match_num=5)
    for src, tgt in o2m:
        assert src.shape == tgt.shape
        assert (tgt >= 0).all()
    print("KERNEL_OK")
</pallas_src>

<mosaic_0001>
module attributes {stable_mosaic.version = 11 : i64} {
  func.func @_cost_kernel(%arg0: i32, %arg1: i32, %arg2: i32, %arg3: memref<1x1x128xf32, #tpu.memory_space<vmem>>, %arg4: memref<1x8x16xf32, #tpu.memory_space<vmem>>, %arg5: memref<1x16x128xf32, #tpu.memory_space<vmem>>, %arg6: memref<1x8x128xf32, #tpu.memory_space<vmem>>) attributes {dimension_semantics = [#tpu.dimension_semantics<parallel>, #tpu.dimension_semantics<parallel>, #tpu.dimension_semantics<parallel>], iteration_bounds = array<i64: 2, 1, 1>, scalar_prefetch = 0 : i64, scratch_operands = 0 : i64, tpu.core_type = #tpu.core_type<tc>, window_params = [{transform_indices = @transform_0, window_bounds = array<i64: 1, 1, 128>}, {transform_indices = @transform_1, window_bounds = array<i64: 1, 8, 16>}, {transform_indices = @transform_2, window_bounds = array<i64: 1, 16, 128>}, {transform_indices = @transform_3, window_bounds = array<i64: 1, 8, 128>}]} {
    %c0 = arith.constant 0 : index
    %c0_0 = arith.constant 0 : index
    %c0_1 = arith.constant 0 : index
    %0 = vector.load %arg5[%c0, %c0_0, %c0_1] : memref<1x16x128xf32, #tpu.memory_space<vmem>>, vector<1x16x128xf32>
    %1 = vector.shape_cast %0 : vector<1x16x128xf32> to vector<16x128xf32>
    %c0_2 = arith.constant 0 : index
    %c0_3 = arith.constant 0 : index
    %c0_4 = arith.constant 0 : index
    %2 = vector.load %arg3[%c0_2, %c0_3, %c0_4] : memref<1x1x128xf32, #tpu.memory_space<vmem>>, vector<1x1x128xf32>
    %3 = vector.shape_cast %2 : vector<1x1x128xf32> to vector<1x128xf32>
    %c0_5 = arith.constant 0 : index
    %c0_6 = arith.constant 0 : index
    %c0_7 = arith.constant 0 : index
    %4 = vector.load %arg4[%c0_5, %c0_6, %c0_7] : memref<1x8x16xf32, #tpu.memory_space<vmem>>, vector<1x8x16xf32>
    %5 = vector.shape_cast %4 : vector<1x8x16xf32> to vector<8x16xf32>
    %6 = vector.extract_strided_slice %5 {offsets = [0, 0], sizes = [8, 1], strides = [1, 1]} : vector<8x16xf32> to vector<8x1xf32>
    %7 = vector.extract_strided_slice %1 {offsets = [0, 0], sizes = [1, 128], strides = [1, 1]} : vector<16x128xf32> to vector<1x128xf32>
    %8 = vector.broadcast %6 : vector<8x1xf32> to vector<8x128xf32>
    %9 = vector.broadcast %7 : vector<1x128xf32> to vector<8x128xf32>
    %10 = arith.subf %8, %9 : vector<8x128xf32>
    %11 = math.absf %10 : vector<8x128xf32>
    %12 = vector.extract_strided_slice %5 {offsets = [0, 1], sizes = [8, 1], strides = [1, 1]} : vector<8x16xf32> to vector<8x1xf32>
    %13 = vector.extract_strided_slice %1 {offsets = [1, 0], sizes = [1, 128], strides = [1, 1]} : vector<16x128xf32> to vector<1x128xf32>
    %14 = vector.broadcast %12 : vector<8x1xf32> to vector<8x128xf32>
    %15 = vector.broadcast %13 : vector<1x128xf32> to vector<8x128xf32>
    %16 = arith.subf %14, %15 : vector<8x128xf32>
    %17 = math.absf %16 : vector<8x128xf32>
    %18 = arith.addf %11, %17 : vector<8x128xf32>
    %19 = vector.extract_strided_slice %5 {offsets = [0, 2], sizes = [8, 1], strides = [1, 1]} : vector<8x16xf32> to vector<8x1xf32>
    %20 = vector.extract_strided_slice %1 {offsets = [2, 0], sizes = [1, 128], strides = [1, 1]} : vector<16x128xf32> to vector<1x128xf32>
    %21 = vector.broadcast %19 : vector<8x1xf32> to vector<8x128xf32>
    %22 = vector.broadcast %20 : vector<1x128xf32> to vector<8x128xf32>
    %23 = arith.subf %21, %22 : vector<8x128xf32>
    %24 = math.absf %23 : vector<8x128xf32>
    %25 = arith.addf %18, %24 : vector<8x128xf32>
    %26 = vector.extract_strided_slice %5 {offsets = [0, 3], sizes = [8, 1], strides = [1, 1]} : vector<8x16xf32> to vector<8x1xf32>
    %27 = vector.extract_strided_slice %1 {offsets = [3, 0], sizes = [1, 128], strides = [1, 1]} : vector<16x128xf32> to vector<1x128xf32>
    %28 = vector.broadcast %26 : vector<8x1xf32> to vector<8x128xf32>
    %29 = vector.broadcast %27 : vector<1x128xf32> to vector<8x128xf32>
    %30 = arith.subf %28, %29 : vector<8x128xf32>
    %31 = math.absf %30 : vector<8x128xf32>
    %32 = arith.addf %25, %31 : vector<8x128xf32>
    %33 = vector.extract_strided_slice %5 {offsets = [0, 4], sizes = [8, 1], strides = [1, 1]} : vector<8x16xf32> to vector<8x1xf32>
    %34 = vector.extract_strided_slice %1 {offsets = [4, 0], sizes = [1, 128], strides = [1, 1]} : vector<16x128xf32> to vector<1x128xf32>
    %35 = vector.broadcast %33 : vector<8x1xf32> to vector<8x128xf32>
    %36 = vector.broadcast %34 : vector<1x128xf32> to vector<8x128xf32>
    %37 = arith.subf %35, %36 : vector<8x128xf32>
    %38 = math.absf %37 : vector<8x128xf32>
    %39 = arith.addf %32, %38 : vector<8x128xf32>
    %40 = vector.extract_strided_slice %5 {offsets = [0, 5], sizes = [8, 1], strides = [1, 1]} : vector<8x16xf32> to vector<8x1xf32>
    %41 = vector.extract_strided_slice %1 {offsets = [5, 0], sizes = [1, 128], strides = [1, 1]} : vector<16x128xf32> to vector<1x128xf32>
    %42 = vector.broadcast %40 : vector<8x1xf32> to vector<8x128xf32>
    %43 = vector.broadcast %41 : vector<1x128xf32> to vector<8x128xf32>
    %44 = arith.subf %42, %43 : vector<8x128xf32>
    %45 = math.absf %44 : vector<8x128xf32>
    %46 = arith.addf %39, %45 : vector<8x128xf32>
    %47 = vector.extract_strided_slice %5 {offsets = [0, 6], sizes = [8, 1], strides = [1, 1]} : vector<8x16xf32> to vector<8x1xf32>
    %48 = vector.extract_strided_slice %1 {offsets = [6, 0], sizes = [1, 128], strides = [1, 1]} : vector<16x128xf32> to vector<1x128xf32>
    %49 = vector.broadcast %47 : vector<8x1xf32> to vector<8x128xf32>
    %50 = vector.broadcast %48 : vector<1x128xf32> to vector<8x128xf32>
    %51 = arith.subf %49, %50 : vector<8x128xf32>
    %52 = math.absf %51 : vector<8x128xf32>
    %53 = arith.addf %46, %52 : vector<8x128xf32>
    %54 = vector.extract_strided_slice %5 {offsets = [0, 7], sizes = [8, 1], strides = [1, 1]} : vector<8x16xf32> to vector<8x1xf32>
    %55 = vector.extract_strided_slice %1 {offsets = [7, 0], sizes = [1, 128], strides = [1, 1]} : vector<16x128xf32> to vector<1x128xf32>
    %56 = vector.broadcast %54 : vector<8x1xf32> to vector<8x128xf32>
    %57 = vector.broadcast %55 : vector<1x128xf32> to vector<8x128xf32>
    %58 = arith.subf %56, %57 : vector<8x128xf32>
    %59 = math.absf %58 : vector<8x128xf32>
    %60 = arith.addf %53, %59 : vector<8x128xf32>
    %61 = vector.extract_strided_slice %5 {offsets = [0, 8], sizes = [8, 1], strides = [1, 1]} : vector<8x16xf32> to vector<8x1xf32>
    %62 = vector.extract_strided_slice %1 {offsets = [8, 0], sizes = [1, 128], strides = [1, 1]} : vector<16x128xf32> to vector<1x128xf32>
    %63 = vector.broadcast %61 : vector<8x1xf32> to vector<8x128xf32>
    %64 = vector.broadcast %62 : vector<1x128xf32> to vector<8x128xf32>
    %65 = arith.subf %63, %64 : vector<8x128xf32>
    %66 = math.absf %65 : vector<8x128xf32>
    %67 = arith.addf %60, %66 : vector<8x128xf32>
    %68 = vector.extract_strided_slice %5 {offsets = [0, 9], sizes = [8, 1], strides = [1, 1]} : vector<8x16xf32> to vector<8x1xf32>
    %69 = vector.extract_strided_slice %1 {offsets = [9, 0], sizes = [1, 128], strides = [1, 1]} : vector<16x128xf32> to vector<1x128xf32>
    %70 = vector.broadcast %68 : vector<8x1xf32> to vector<8x128xf32>
    %71 = vector.broadcast %69 : vector<1x128xf32> to vector<8x128xf32>
    %72 = arith.subf %70, %71 : vector<8x128xf32>
    %73 = math.absf %72 : vector<8x128xf32>
    %74 = arith.addf %67, %73 : vector<8x128xf32>
    %75 = vector.extract_strided_slice %5 {offsets = [0, 10], sizes = [8, 1], strides = [1, 1]} : vector<8x16xf32> to vector<8x1xf32>
    %76 = vector.extract_strided_slice %1 {offsets = [10, 0], sizes = [1, 128], strides = [1, 1]} : vector<16x128xf32> to vector<1x128xf32>
    %77 = vector.broadcast %75 : vector<8x1xf32> to vector<8x128xf32>
    %78 = vector.broadcast %76 : vector<1x128xf32> to vector<8x128xf32>
    %79 = arith.subf %77, %78 : vector<8x128xf32>
    %80 = math.absf %79 : vector<8x128xf32>
    %81 = arith.addf %74, %80 : vector<8x128xf32>
    %82 = vector.extract_strided_slice %5 {offsets = [0, 11], sizes = [8, 1], strides = [1, 1]} : vector<8x16xf32> to vector<8x1xf32>
    %83 = vector.extract_strided_slice %1 {offsets = [11, 0], sizes = [1, 128], strides = [1, 1]} : vector<16x128xf32> to vector<1x128xf32>
    %84 = vector.broadcast %82 : vector<8x1xf32> to vector<8x128xf32>
    %85 = vector.broadcast %83 : vector<1x128xf32> to vector<8x128xf32>
    %86 = arith.subf %84, %85 : vector<8x128xf32>
    %87 = math.absf %86 : vector<8x128xf32>
    %88 = arith.addf %81, %87 : vector<8x128xf32>
    %89 = vector.extract_strided_slice %5 {offsets = [0, 12], sizes = [8, 1], strides = [1, 1]} : vector<8x16xf32> to vector<8x1xf32>
    %90 = vector.extract_strided_slice %1 {offsets = [12, 0], sizes = [1, 128], strides = [1, 1]} : vector<16x128xf32> to vector<1x128xf32>
    %91 = vector.broadcast %89 : vector<8x1xf32> to vector<8x128xf32>
    %92 = vector.broadcast %90 : vector<1x128xf32> to vector<8x128xf32>
    %93 = arith.subf %91, %92 : vector<8x128xf32>
    %94 = math.absf %93 : vector<8x128xf32>
    %95 = arith.addf %88, %94 : vector<8x128xf32>
    %96 = vector.extract_strided_slice %5 {offsets = [0, 13], sizes = [8, 1], strides = [1, 1]} : vector<8x16xf32> to vector<8x1xf32>
    %97 = vector.extract_strided_slice %1 {offsets = [13, 0], sizes = [1, 128], strides = [1, 1]} : vector<16x128xf32> to vector<1x128xf32>
    %98 = vector.broadcast %96 : vector<8x1xf32> to vector<8x128xf32>
    %99 = vector.broadcast %97 : vector<1x128xf32> to vector<8x128xf32>
    %100 = arith.subf %98, %99 : vector<8x128xf32>
    %101 = math.absf %100 : vector<8x128xf32>
    %102 = arith.addf %95, %101 : vector<8x128xf32>
    %103 = vector.extract_strided_slice %5 {offsets = [0, 14], sizes = [8, 1], strides = [1, 1]} : vector<8x16xf32> to vector<8x1xf32>
    %104 = vector.extract_strided_slice %1 {offsets = [14, 0], sizes = [1, 128], strides = [1, 1]} : vector<16x128xf32> to vector<1x128xf32>
    %105 = vector.broadcast %103 : vector<8x1xf32> to vector<8x128xf32>
    %106 = vector.broadcast %104 : vector<1x128xf32> to vector<8x128xf32>
    %107 = arith.subf %105, %106 : vector<8x128xf32>
    %108 = math.absf %107 : vector<8x128xf32>
    %109 = arith.addf %102, %108 : vector<8x128xf32>
    %110 = vector.extract_strided_slice %5 {offsets = [0, 15], sizes = [8, 1], strides = [1, 1]} : vector<8x16xf32> to vector<8x1xf32>
    %111 = vector.extract_strided_slice %1 {offsets = [15, 0], sizes = [1, 128], strides = [1, 1]} : vector<16x128xf32> to vector<1x128xf32>
    %112 = vector.broadcast %110 : vector<8x1xf32> to vector<8x128xf32>
    %113 = vector.broadcast %111 : vector<1x128xf32> to vector<8x128xf32>
    %114 = arith.subf %112, %113 : vector<8x128xf32>
    %115 = math.absf %114 : vector<8x128xf32>
    %116 = arith.addf %109, %115 : vector<8x128xf32>
    %117 = vector.broadcast %3 : vector<1x128xf32> to vector<8x128xf32>
    %118 = arith.addf %117, %116 : vector<8x128xf32>
    %c0_8 = arith.constant 0 : index
    %c0_9 = arith.constant 0 : index
    %c0_10 = arith.constant 0 : index
    %119 = vector.load %arg6[%c0_8, %c0_9, %c0_10] : memref<1x8x128xf32, #tpu.memory_space<vmem>>, vector<1x8x128xf32>
    %120 = vector.shape_cast %119 : vector<1x8x128xf32> to vector<8x128xf32>
    %121 = vector.shape_cast %118 : vector<8x128xf32> to vector<1x8x128xf32>
    tpu.vector_store %arg6[%c0_8, %c0_9, %c0_10], %121 {strides = array<i32>} : memref<1x8x128xf32, #tpu.memory_space<vmem>>, vector<1x8x128xf32>,
    return
  }
  func.func @transform_0(%arg0: i32, %arg1: i32, %arg2: i32) -> (i32, i32, i32) {
    %c0_i32 = arith.constant 0 : i32
    %c0_i32_0 = arith.constant 0 : i32
    return %arg0, %c0_i32, %arg2 : i32, i32, i32
  }
  func.func @transform_1(%arg0: i32, %arg1: i32, %arg2: i32) -> (i32, i32, i32) {
    %c0_i32 = arith.constant 0 : i32
    %c0_i32_0 = arith.constant 0 : i32
    return %arg0, %arg1, %c0_i32 : i32, i32, i32
  }
  func.func @transform_2(%arg0: i32, %arg1: i32, %arg2: i32) -> (i32, i32, i32) {
    %c0_i32 = arith.constant 0 : i32
    %c0_i32_0 = arith.constant 0 : i32
    return %arg0, %c0_i32, %arg2 : i32, i32, i32
  }
  func.func @transform_3(%arg0: i32, %arg1: i32, %arg2: i32) -> (i32, i32, i32) {
    %c0_i32 = arith.constant 0 : i32
    return %arg0, %arg1, %arg2 : i32, i32, i32
  }
}

</mosaic_0001>

<bundles_post_ra>
// kernel: squeeze.10
= control target key start
LH: loop header
LB: loop body
LE: loop exit
PB: predicated region body
PF: predicated region fallthrough
CT: control target
= control target key end

     0   :  { %vm3_vm0 = vcmask 64512   ;;  %s38_s0 = inlined_call_operand.vmem [shape: f32[6,8], index: 0, kind: input, shape index: {}]   ;;  %s39_s1 = inlined_call_operand.vmem [shape: f32[2,3,8], index: 1, kind: output, shape index: {}]  }
   0x1   :  { %v2_v0 = vld [vmem:[%s38_s0] sm:$0x3f]  }
   0x2   :  { %4 = vst.msk [vmem:[#allocation0] sm:$0x7] %vm3_vm0, %v2_v0   ;;  %6 = vst.msk [vmem:[#allocation0 + $0x5] sm:$0x38] %vm3_vm0, %v2_v0  }
   0x9   :  { %v10_v1 = vld [vmem:[#allocation0] sm:$0xf]  ;;  %v14_v2 = vld [vmem:[#allocation0 + $0x8] sm:$0xf] }
   0xa   :  { %12 = vst [vmem:[%s39_s1] sm:$0xf] %v10_v1  ;;  %18 = vst [vmem:[%s39_s1 + $0x4] sm:$0xf] %v14_v2 }

// kernel: _forward_device.1
= control target key start
LH: loop header
LB: loop body
LE: loop exit
PB: predicated region body
PF: predicated region fallthrough
CT: control target
= control target key end

     0   :  { %s703_s12 = smov 0   ;;  %s705_s13 = smov 0   ;;  %s765_s0 = inlined_call_operand.vmem [shape: f32[2,1,128], index: 0, kind: input, shape index: {}]   ;;  %s766_s1 = inlined_call_operand.vmem [shape: f32[2,8,16], index: 1, kind: input, shape index: {}]   ;;  %s767_s2 = inlined_call_operand.vmem [shape: f32[2,16,128], index: 2, kind: input, shape index: {}]   ;;  %s768_s3 = inlined_call_operand.vmem [shape: f32[2,8,128], index: 3, kind: output, shape index: {}]  }
   0x1   :  { %s707_s14 = smov 0  }
   0x2 LB: > { %s32_s15 = sadd.s32 1, %s661_s13  ;;  %p577_p0 = scmp.ge.s32.totalorder %s665_s14, 1  ;;  %s665_s14 = sphi %s707_s14, %s13_s14   ;;  %s661_s13 = sphi %s705_s13, %s770_s13   ;;  %s657_s12 = sphi %s703_s12, %s769_s12  }
   0x3   : > { %p34_p1 = scmp.ge.s32.totalorder %s32_s15, 2  ;;  %p192_p2 = scmp.lt.s32.totalorder %s665_s14, 3 }
   0x5   : > { %s772_s15 = smov (%p34_p1, %s32_s15), 0  ;;  %p193_p3 = pnand %p577_p0, %p192_p2 }
   0x6   : > { %p237_p4 = scmp.lt.s32.totalorder (!%p193_p3), %s657_s12, 1  ;;  %v667_v0 = vmov (!%p193_p3), 2   ;;  %v668_v1 = vmov (!%p193_p3), 0   ;;  %v669_v3 = vmov (!%p193_p3), 3   ;;  %v670_v4 = vmov (!%p193_p3), 1  }
   0x7   : > { %196 = sbr.rel (%p193_p3) target bundleno = 200 (0xc8), region = 32  ;;  %628 = vset.pattern.permute.xlu1 (!%p193_p3), %v667_v0  ;;  %626 = vset.pattern.permute.xlu0 (!%p193_p3), %v668_v1  ;;  %v671_v5 = vmov (!%p193_p3), 4   ;;  %v672_v6 = vmov (!%p193_p3), 5   ;;  %v673_v7 = vmov (!%p193_p3), 6   ;;  %v674_v8 = vmov (!%p193_p3), 8  }
   0x8   : > { %v675_v9 = vmov (!%p193_p3), 7   ;;  %v676_v10 = vmov (!%p193_p3), 11   ;;  %v677_v11 = vmov (!%p193_p3), 9   ;;  %v678_v12 = vmov (!%p193_p3), 14  }
   0x9   : > { %v679_v13 = vmov (!%p193_p3), 10   ;;  %v680_v14 = vmov (!%p193_p3), 15   ;;  %v681_v15 = vmov (!%p193_p3), 12   ;;  %v682_v16 = vmov (!%p193_p3), 13  }
   0xa   : > { %v277_v17 = vlaneseq (!%p193_p3) }
   0xc   : > { %v730_v18 = vshrl.u32 (!%p193_p3), %v277_v17, 7 }
   0xe   : > { %s774_s12 = smov (!%p237_p4, %s657_s12), 1  ;;  %v279_v19 = vsub.s32 0, %v730_v18  ;;  %v300_v21 = vsub.s32 2, %v730_v18  ;;  %v289_v23 = vsub.s32 1, %v730_v18  ;;  %v311_v26 = vsub.s32 3, %v730_v18 }
   0xf   : > { %s578_s16 = sshll.u32 %s774_s12, 3  ;;  %s585_s20 = sshll.u32 %s774_s12, 4  ;;  %v322_v30 = vsub.s32 4, %v730_v18  ;;  %v333_v31 = vsub.s32 5, %v730_v18  ;;  %v344_v42 = vsub.s32 6, %v730_v18  ;;  %v355_v53 = vsub.s32 7, %v730_v18 }
  0x10   : > { %s249_s19 = scalar_lea.vmem %s766_s1, %s578_s16  ;;  %s735_s23 = scalar_lea.vmem %s767_s2, %s585_s20 }
  0x11   : > { %v271_v2 = vld [vmem:[%s249_s19] sm:$0xff]  ;;  %v269_v55 = vld [vmem:[%s735_s23 + $0x8] sm:$0xff]  ;;  %s242_s26 = scalar_lea.vmem %s765_s0, %s774_s12  ;;  %s267_s29 = scalar_lea.vmem %s768_s3, %s578_s16 }
  0x12   : > { %295 = vperm.xlu1 %628, %v271_v2   ;;  %274 = vperm.xlu0 %626, %v271_v2   ;;  %v268_v20 = vld [vmem:[%s735_s23] sm:$0xff]  ;;  %v367_v61 = vrot.slane %v269_v55, %v279_v19 }
  0x13   : > { %v280_v22 = vrot.slane %v268_v20, %v279_v19  ;;  %v301_v27 = vrot.slane %v268_v20, %v300_v21  ;;  %v290_v29 = vrot.slane %v268_v20, %v289_v23  ;;  %v312_v32 = vrot.slane %v268_v20, %v311_v26 }
  0x14   : > { %v323_v38 = vrot.slane %v268_v20, %v322_v30  ;;  %v334_v39 = vrot.slane %v268_v20, %v333_v31  ;;  %v345_v51 = vrot.slane %v268_v20, %v344_v42  ;;  %v356_v60 = vrot.slane %v268_v20, %v355_v53 }
  0x15   : > { %v411_v19 = vrot.slane %v269_v55, %v322_v30 }
  0x16   : > { %629 = vset.pattern.permute.xlu1 %v669_v3  ;;  %627 = vset.pattern.permute.xlu0 %v670_v4  ;;  %v378_v4 = vrot.slane %v269_v55, %v289_v23 }
  0x17   : > { %306 = vperm.xlu1 %629, %v271_v2   ;;  %284 = vperm.xlu0 %627, %v271_v2  }
  0x1b   : > { %630 = vset.pattern.permute.xlu1 %v671_v5  ;;  %631 = vset.pattern.permute.xlu0 %v672_v6 }
  0x1c   : > { %317 = vperm.xlu1 %630, %v271_v2   ;;  %328 = vperm.xlu0 %631, %v271_v2  }
  0x20   : > { %632 = vset.pattern.permute.xlu1 %v673_v7  ;;  %634 = vset.pattern.permute.xlu0 %v674_v8 }
  0x21   : > { %339 = vperm.xlu1 %632, %v271_v2   ;;  %361 = vperm.xlu0 %634, %v271_v2  }
  0x25   : > { %633 = vset.pattern.permute.xlu1 %v675_v9  ;;  %637 = vset.pattern.permute.xlu0 %v676_v10 }
  0x26   : > { %350 = vperm.xlu1 %633, %v271_v2   ;;  %394 = vperm.xlu0 %637, %v271_v2  }
  0x2a   : > { %635 = vset.pattern.permute.xlu1 %v677_v11  ;;  %640 = vset.pattern.permute.xlu0 %v678_v12  ;;  %v389_v11 = vrot.slane %v269_v55, %v300_v21  ;;  %v400_v12 = vrot.slane %v269_v55, %v311_v26 }
  0x2b   : > { %372 = vperm.xlu1 %635, %v271_v2   ;;  %427 = vperm.xlu0 %640, %v271_v2  }
  0x2f   : > { %636 = vset.pattern.permute.xlu1 %v679_v13  ;;  %642 = vset.pattern.permute.xlu0 %v680_v14 }
  0x30   : > { %383 = vperm.xlu1 %636, %v271_v2  }
  0x34   : > { %638 = vset.pattern.permute.xlu1 %v681_v15 }
  0x35   : > { %405 = vperm.xlu1 %638, %v271_v2  }
  0x39   : > { %639 = vset.pattern.permute.xlu1 %v682_v16 }
  0x3a   : > { %416 = vperm.xlu1 %639, %v271_v2  }
  0x3e   : > { %641 = vset.pattern.permute.xlu1 %v680_v14 }
  0x3f   : > { %438 = vperm.xlu1 %641, %v271_v2  }
  0x91   : > { %v296_v24 = vpop.permute.xlu1 %295  ;;  %v275_v25 = vpop.permute.xlu0 %274 }
  0x92   : > { %v281_v28 = vsub.f32 %v275_v25, %v280_v22  ;;  %v302_v35 = vsub.f32 %v296_v24, %v301_v27  ;;  %v433_v27 = vrot.slane %v269_v55, %v344_v42 }
  0x94   : > { %v282_v36 = vand.u32 2147483647, %v281_v28  ;;  %v303_v43 = vand.u32 2147483647, %v302_v35 }
  0x96   : > { %v307_v33 = vpop.permute.xlu1 %306  ;;  %v285_v34 = vpop.permute.xlu0 %284 }
  0x97   : > { %v291_v37 = vsub.f32 %v285_v34, %v290_v29  ;;  %v313_v40 = vsub.f32 %v307_v33, %v312_v32  ;;  %v422_v32 = vrot.slane %v269_v55, %v333_v31  ;;  %v582_v31 = vld [vmem:[%s242_s26] ss:$0 sm:$0xff] }
  0x99   : > { %v292_v41 = vand.u32 2147483647, %v291_v37  ;;  %v314_v49 = vand.u32 2147483647, %v313_v40 }
  0x9b   : > { %v293_v44 = vadd.f32 %v292_v41, %v282_v36  ;;  %v318_v45 = vpop.permute.xlu1 %317  ;;  %v329_v46 = vpop.permute.xlu0 %328  ;;  %v444_v36 = vrot.slane %v269_v55, %v355_v53 }
  0x9c   : > { %v324_v47 = vsub.f32 %v318_v45, %v323_v38  ;;  %v335_v48 = vsub.f32 %v329_v46, %v334_v39 }
  0x9d   : > { %v304_v50 = vadd.f32 %v303_v43, %v293_v44 }
  0x9e   : > { %v325_v52 = vand.u32 2147483647, %v324_v47  ;;  %v336_v56 = vand.u32 2147483647, %v335_v48 }
  0x9f   : > { %v315_v54 = vadd.f32 %v314_v49, %v304_v50 }
  0xa0   : > { %v340_v57 = vpop.permute.xlu1 %339  ;;  %v362_v62 = vpop.permute.xlu0 %361 }
  0xa1   : > { %v326_v58 = vadd.f32 %v325_v52, %v315_v54  ;;  %v346_v59 = vsub.f32 %v340_v57, %v345_v51  ;;  %v368_v3 = vsub.f32 %v362_v62, %v367_v61 }
  0xa3   : > { %v337_v63 = vadd.f32 %v336_v56, %v326_v58  ;;  %v347_v0 = vand.u32 2147483647, %v346_v59  ;;  %v369_v8 = vand.u32 2147483647, %v368_v3 }
  0xa5   : > { %v351_v1 = vpop.permute.xlu1 %350  ;;  %v348_v5 = vadd.f32 %v347_v0, %v337_v63  ;;  %v395_v13 = vpop.permute.xlu0 %394 }
  0xa6   : > { %v357_v2 = vsub.f32 %v351_v1, %v356_v60  ;;  %v401_v18 = vsub.f32 %v395_v13, %v400_v12 }
  0xa8   : > { %v358_v6 = vand.u32 2147483647, %v357_v2  ;;  %v402_v25 = vand.u32 2147483647, %v401_v18 }
  0xaa   : > { %v359_v7 = vadd.f32 %v358_v6, %v348_v5  ;;  %v373_v9 = vpop.permute.xlu1 %372  ;;  %v428_v29 = vpop.permute.xlu0 %427 }
  0xab   : > { %v379_v10 = vsub.f32 %v373_v9, %v378_v4  ;;  %v434_v26 = vsub.f32 %v428_v29, %v433_v27 }
  0xac   : > { %v370_v14 = vadd.f32 %v369_v8, %v359_v7 }
  0xad   : > { %v380_v15 = vand.u32 2147483647, %v379_v10  ;;  %v435_v30 = vand.u32 2147483647, %v434_v26 }
  0xaf   : > { %v384_v16 = vpop.permute.xlu1 %383  ;;  %v381_v20 = vadd.f32 %v380_v15, %v370_v14 }
  0xb0   : > { %v390_v17 = vsub.f32 %v384_v16, %v389_v11 }
  0xb2   : > { %v391_v22 = vand.u32 2147483647, %v390_v17 }
  0xb4   : > { %v392_v24 = vadd.f32 %v391_v22, %v381_v20  ;;  %v406_v23 = vpop.permute.xlu1 %405 }
  0xb5   : > { %v412_v28 = vsub.f32 %v406_v23, %v411_v19 }
  0xb6   : > { %v403_v33 = vadd.f32 %v402_v25, %v392_v24 }
  0xb7   : > { %v413_v21 = vand.u32 2147483647, %v412_v28 }
  0xb9   : > { %v417_v34 = vpop.permute.xlu1 %416  ;;  %v414_v37 = vadd.f32 %v413_v21, %v403_v33 }
  0xba   : > { %v423_v35 = vsub.f32 %v417_v34, %v422_v32 }
  0xbc   : > { %v424_v38 = vand.u32 2147483647, %v423_v35 }
  0xbe   : > { %v425_v39 = vadd.f32 %v424_v38, %v414_v37  ;;  %v439_v40 = vpop.permute.xlu1 %438 }
  0xbf   : > { %v445_v41 = vsub.f32 %v439_v40, %v444_v36 }
  0xc0   : > { %v436_v42 = vadd.f32 %v435_v30, %v425_v39 }
  0xc1   : > { %v446_v43 = vand.u32 2147483647, %v445_v41 }
  0xc3   : > { %v447_v44 = vadd.f32 %v446_v43, %v436_v42 }
  0xc5   : > { %v454_v45 = vadd.f32 %v582_v31, %v447_v44 }
  0xc7   : > { %455 = vst [vmem:[%s267_s29] sm:$0xff] %v454_v45 }
  0xc8 PF: > { %s13_s14 = sadd.s32 1, %s665_s14   ;;  %s769_s12 = smov %s661_s13 }
  0xc9   : > { %p10_p5 = scmp.ge.s32.totalorder %s13_s14, 4   ;;  %s770_s13 = smov %s772_s15 }
  0xcb   :  { %12 = sbr.rel (!%p10_p5) target bundleno = 2 (0x2), region = 68 }

</bundles_post_ra>
